<compile_context>
chip_gen: v7x
topology: tpu7x:2x2x1
jax: 0.10.0
libtpu: 0.0.40
codegen_flags: <defaults>
</compile_context>

<pallas_src>
import functools

import jax
import jax.numpy as jnp
import numpy as np
from jax.experimental import pallas as pl
from jax.experimental.pallas import tpu as pltpu


def _round_up(x, k):
    return (x + k - 1) // k * k


def prob_enc_kernel(x_ref, w_ref, b_ref, eps_ref, o_ref, *, m_pad):
    # One fused MXU matmul for both heads: y = x @ [W_mu | 0.5*W_lv] + b_cat
    y = jnp.dot(x_ref[...], w_ref[...],
                preferred_element_type=jnp.float32) + b_ref[...]
    mu = y[:, :m_pad]              # lane-aligned split (m_pad is a multiple of 128)
    log_std = y[:, m_pad:]         # already 0.5 * logvar (scale folded into weights)
    std = jnp.exp(log_std)         # EUP
    o_ref[...] = (mu + eps_ref[...] * std).astype(o_ref.dtype)


def prob_enc_forward(x, w_mu, b_mu, w_lv, b_lv, eps, *, block_b=512):
    """z = mu(x) + eps * exp(0.5 * logvar(x)).

    x:    [B, n] f32
    w_*:  [n, m] f32   (pre-transposed vs PyTorch's nn.Linear [m, n] storage)
    b_*:  [m] or [1, m] f32
    eps:  [B, m] f32 standard-normal noise (torch.randn_like equivalent)
    returns: [B, m] f32
    """
    B, n = x.shape
    m = w_mu.shape[1]
    b_mu = jnp.reshape(b_mu, (1, m)).astype(jnp.float32)
    b_lv = jnp.reshape(b_lv, (1, m)).astype(jnp.float32)

    # --- Fused, lane-dense parameter layout (pad m -> multiple of 128). ---
    m_pad = _round_up(m, 128)
    w_cat = jnp.zeros((n, 2 * m_pad), jnp.float32)
    w_cat = w_cat.at[:, :m].set(w_mu)
    w_cat = w_cat.at[:, m_pad:m_pad + m].set(0.5 * w_lv)   # fold 0.5 into weights
    b_cat = jnp.zeros((1, 2 * m_pad), jnp.float32)
    b_cat = b_cat.at[:, :m].set(b_mu)
    b_cat = b_cat.at[:, m_pad:m_pad + m].set(0.5 * b_lv)
    # Zero-padded logvar lanes -> logvar_half = 0 -> std = 1 (finite), sliced off.

    # bf16 MXU inputs, f32 accumulate / elementwise.
    x_bf = x.astype(jnp.bfloat16)
    w_bf = w_cat.astype(jnp.bfloat16)

    # --- Batch tiling. ---
    tb = min(block_b, _round_up(B, 8))
    b_pad = _round_up(B, tb)
    if b_pad != B:
        x_bf = jnp.pad(x_bf, ((0, b_pad - B), (0, 0)))
    eps_p = jnp.zeros((b_pad, m_pad), jnp.float32).at[:B, :m].set(eps)

    grid = (b_pad // tb,)
    out = pl.pallas_call(
        functools.partial(prob_enc_kernel, m_pad=m_pad),
        out_shape=jax.ShapeDtypeStruct((b_pad, m_pad), jnp.float32),
        grid=grid,
        in_specs=[
            pl.BlockSpec((tb, n), lambda i: (i, 0)),            # x tile
            pl.BlockSpec((n, 2 * m_pad), lambda i: (0, 0)),     # fused weight (resident)
            pl.BlockSpec((1, 2 * m_pad), lambda i: (0, 0)),     # fused bias (resident)
            pl.BlockSpec((tb, m_pad), lambda i: (i, 0)),        # eps tile
        ],
        out_specs=pl.BlockSpec((tb, m_pad), lambda i: (i, 0)),  # lane-dense output
        compiler_params=pltpu.CompilerParams(
            dimension_semantics=("parallel",)),
    )(x_bf, w_bf, b_cat, eps_p)

    return out[:B, :m]


if __name__ == "__main__":
    B, n, m = 8, 32, 16   # small shapes consistent with nn.Linear(n, m)

    key = jax.random.PRNGKey(0)
    kx, kwm, kbm, kwl, kbl, ke = jax.random.split(key, 6)

    # Deterministic param init matching PyTorch nn.Linear default
    # (uniform in [-1/sqrt(n), 1/sqrt(n)]).
    bound = 1.0 / (n ** 0.5)
    x = jax.random.normal(kx, (B, n), dtype=jnp.float32)
    w_mu = jax.random.uniform(kwm, (n, m), jnp.float32, -bound, bound)
    b_mu = jax.random.uniform(kbm, (1, m), jnp.float32, -bound, bound)
    w_lv = jax.random.uniform(kwl, (n, m), jnp.float32, -bound, bound)
    b_lv = jax.random.uniform(kbl, (1, m), jnp.float32, -bound, bound)
    eps = jax.random.normal(ke, (B, m), dtype=jnp.float32)

    out = prob_enc_forward(x, w_mu, b_mu, w_lv, b_lv, eps)
    jax.block_until_ready(out)

    assert out.shape == (B, m), out.shape
    assert bool(jnp.all(jnp.isfinite(out)))

    # Pure-JAX reference using the same bf16 quantization of the matmul inputs.
    xb = x.astype(jnp.bfloat16).astype(jnp.float32)
    wmu_b = w_mu.astype(jnp.bfloat16).astype(jnp.float32)
    wlv_half_b = (0.5 * w_lv).astype(jnp.bfloat16).astype(jnp.float32)
    mu_ref = xb @ wmu_b + b_mu
    log_std_ref = xb @ wlv_half_b + 0.5 * b_lv
    z_ref = mu_ref + eps * jnp.exp(log_std_ref)

    np.testing.assert_allclose(np.asarray(out), np.asarray(z_ref),
                               rtol=2e-2, atol=2e-2)

    print("KERNEL_OK")
</pallas_src>

<mosaic_0001>
module attributes {stable_mosaic.version = 11 : i64} {
  func.func @prob_enc_kernel(%arg0: i32, %arg1: memref<8x32xbf16, #tpu.memory_space<vmem>>, %arg2: memref<32x256xbf16, #tpu.memory_space<vmem>>, %arg3: memref<1x256xf32, #tpu.memory_space<vmem>>, %arg4: memref<8x128xf32, #tpu.memory_space<vmem>>, %arg5: memref<8x128xf32, #tpu.memory_space<vmem>>) attributes {dimension_semantics = [#tpu.dimension_semantics<parallel>], iteration_bounds = array<i64: 1>, scalar_prefetch = 0 : i64, scratch_operands = 0 : i64, tpu.core_type = #tpu.core_type<tc>, window_params = [{transform_indices = @transform_0, window_bounds = array<i64: 8, 32>}, {pipeline_mode = #tpu.pipeline_mode<synchronous>, transform_indices = @transform_1, window_bounds = array<i64: 32, 256>}, {pipeline_mode = #tpu.pipeline_mode<synchronous>, transform_indices = @transform_2, window_bounds = array<i64: 1, 256>}, {transform_indices = @transform_3, window_bounds = array<i64: 8, 128>}, {transform_indices = @transform_4, window_bounds = array<i64: 8, 128>}]} {
    %c0 = arith.constant 0 : index
    %c0_0 = arith.constant 0 : index
    %0 = vector.load %arg1[%c0, %c0_0] : memref<8x32xbf16, #tpu.memory_space<vmem>>, vector<8x32xbf16>
    %c0_1 = arith.constant 0 : index
    %c0_2 = arith.constant 0 : index
    %1 = vector.load %arg2[%c0_1, %c0_2] : memref<32x256xbf16, #tpu.memory_space<vmem>>, vector<32x256xbf16>
    %cst = arith.constant dense<0.000000e+00> : vector<8x256xf32>
    %2 = tpu.matmul %0, %1, %cst {dimension_numbers = #tpu.dot_dimension_numbers<[1], [0], [0], [1], [0, 0, 1, 1], [], []>} : vector<8x32xbf16>, vector<32x256xbf16>, vector<8x256xf32> -> vector<8x256xf32>
    %c0_3 = arith.constant 0 : index
    %c0_4 = arith.constant 0 : index
    %3 = vector.load %arg3[%c0_3, %c0_4] : memref<1x256xf32, #tpu.memory_space<vmem>>, vector<1x256xf32>
    %4 = vector.broadcast %3 : vector<1x256xf32> to vector<8x256xf32>
    %5 = arith.addf %2, %4 : vector<8x256xf32>
    %6 = vector.extract_strided_slice %5 {offsets = [0, 0], sizes = [8, 128], strides = [1, 1]} : vector<8x256xf32> to vector<8x128xf32>
    %7 = vector.extract_strided_slice %5 {offsets = [0, 128], sizes = [8, 128], strides = [1, 1]} : vector<8x256xf32> to vector<8x128xf32>
    %8 = math.exp %7 : vector<8x128xf32>
    %c0_5 = arith.constant 0 : index
    %c0_6 = arith.constant 0 : index
    %9 = vector.load %arg4[%c0_5, %c0_6] : memref<8x128xf32, #tpu.memory_space<vmem>>, vector<8x128xf32>
    %10 = arith.mulf %9, %8 : vector<8x128xf32>
    %11 = arith.addf %6, %10 : vector<8x128xf32>
    %c0_7 = arith.constant 0 : index
    %c0_8 = arith.constant 0 : index
    %12 = vector.load %arg5[%c0_7, %c0_8] : memref<8x128xf32, #tpu.memory_space<vmem>>, vector<8x128xf32>
    tpu.vector_store %arg5[%c0_7, %c0_8], %11 {strides = array<i32>} : memref<8x128xf32, #tpu.memory_space<vmem>>, vector<8x128xf32>,
    return
  }
  func.func @transform_0(%arg0: i32) -> (i32, i32) {
    %c0_i32 = arith.constant 0 : i32
    %c0_i32_0 = arith.constant 0 : i32
    return %arg0, %c0_i32 : i32, i32
  }
  func.func @transform_1(%arg0: i32) -> (i32, i32) {
    %c0_i32 = arith.constant 0 : i32
    %c0_i32_0 = arith.constant 0 : i32
    %c0_i32_1 = arith.constant 0 : i32
    return %c0_i32, %c0_i32_0 : i32, i32
  }
  func.func @transform_2(%arg0: i32) -> (i32, i32) {
    %c0_i32 = arith.constant 0 : i32
    %c0_i32_0 = arith.constant 0 : i32
    %c0_i32_1 = arith.constant 0 : i32
    return %c0_i32, %c0_i32_0 : i32, i32
  }
  func.func @transform_3(%arg0: i32) -> (i32, i32) {
    %c0_i32 = arith.constant 0 : i32
    %c0_i32_0 = arith.constant 0 : i32
    return %arg0, %c0_i32 : i32, i32
  }
  func.func @transform_4(%arg0: i32) -> (i32, i32) {
    %c0_i32 = arith.constant 0 : i32
    %c0_i32_0 = arith.constant 0 : i32
    return %arg0, %c0_i32 : i32, i32
  }
}

</mosaic_0001>

<bundles_post_ra>
// kernel: tpu_custom_call.1
= control target key start
LH: loop header
LB: loop body
LE: loop exit
PB: predicated region body
PF: predicated region fallthrough
CT: control target
= control target key end

     0   :  { %9 = vsyncpa [#allocation3], 0  ;;  %s320_s0 = inlined_call_operand.hbm [shape: bf16[8,32], index: 0, kind: input, shape index: {}]   ;;  %s321_s1 = inlined_call_operand.hbm [shape: bf16[32,256], index: 1, kind: input, shape index: {}]   ;;  %s322_s2 = inlined_call_operand.vmem [shape: f32[1,256], index: 2, kind: input, shape index: {}]   ;;  %s323_s3 = inlined_call_operand.vmem [shape: f32[8,128], index: 3, kind: input, shape index: {}]   ;;  %s324_s4 = inlined_call_operand.hbm [shape: f32[8,128], index: 4, kind: output, shape index: {}]  }
   0x1   :  { %10 = vsyncpa [#allocation6], 0 }
   0x2   :  { %11 = vsyncpa [#allocation4], 0  ;;  %s240_s15 = smov [#allocation2]   ;;  %s241_s17 = smov [#allocation5]  }
   0x3   :  { %s18_s16 = sshll.u32 %s240_s15, 4  ;;  %s27_s18 = sshll.u32 %s241_s17, 4  ;;  %s19_s16 = int_to_ptr.vmem [resolvable:$true] %s18_s16  ;;  %s271_s18 = int_to_ptr.vmem [resolvable:$true] %s27_s18 }
   0x4   :  { %s168_s21 = scalar_lea.hbm %s320_s0, 64 }
   0x5   :  { %p169_p0 = scmp.ne.s32.totalorder %s320_s0, %s168_s21  ;;  %p172_p1 = scmp.lt.u32.totalorder %s168_s21, %s320_s0 }
   0x7   :  { %p174_p2 = pnand %p172_p1, %p169_p0 }
   0x9   :  { %177 = shalt.err (!%p174_p2)
}
   0xa   :  { %s178_s26 = scalar_lea.vmem %s19_s16, 64  ;;  %p183_p4 = scmp.lt.s32.totalorder %s19_s16, %s19_s16 }
   0xb   :  { %p179_p3 = scmp.ne.s32.totalorder %s19_s16, %s178_s26  ;;  %p184_p5 = scmp.lt.s32.totalorder %s178_s26, %s178_s26 }
   0xd   :  { %p185_p6 = por %p184_p5, %p183_p4 }
   0xf   :  { %p186_p7 = pnand %p185_p6, %p179_p3 }
  0x11   :  { %189 = shalt.err (!%p186_p7)
}
  0x12   :  { %21 = dma.hbm_to_vmem [thread:$0]  %s320_s0, 64, %s19_s16, [#allocation3]  }
  0x13   :  { %s190_s5 = scalar_lea.hbm %s321_s1, 512 }
  0x14   :  { %p191_p8 = scmp.ne.s32.totalorder %s321_s1, %s190_s5  ;;  %p194_p9 = scmp.lt.u32.totalorder %s190_s5, %s321_s1 }
  0x16   :  { %p196_p10 = pnand %p194_p9, %p191_p8 }
  0x18   :  { %199 = shalt.err (!%p196_p10)
}
  0x19   :  { %s200_s10 = scalar_lea.vmem %s271_s18, 512  ;;  %p205_p12 = scmp.lt.s32.totalorder %s271_s18, %s271_s18 }
  0x1a   :  { %p201_p11 = scmp.ne.s32.totalorder %s271_s18, %s200_s10  ;;  %p206_p13 = scmp.lt.s32.totalorder %s200_s10, %s200_s10 }
  0x1c   :  { %p207_p0 = por %p206_p13, %p205_p12 }
  0x1e   :  { %p208_p1 = pnand %p207_p0, %p201_p11 }
  0x20   :  { %211 = shalt.err (!%p208_p1)
}
  0x21   :  { %s242_s0 = smov 128   ;;  %s243_s11 = smov 8  }
  0x22   :  { %33 = dma.hbm_to_vmem [thread:$0]  %s321_s1, 512, %s271_s18, [#allocation6], %s242_s0, %s242_s0, %s243_s11  }
  0x23   :  { %234 = dma.done.wait [#allocation3], 64  }
  0x24   :  { %235 = vsyncadd [#allocation3], 4294967232 }
  0x25   :  { %236 = dma.done.wait [#allocation6], 512  }
  0x26   :  { %237 = vsyncadd [#allocation6], 4294966784  ;;  %v244_v0 = vmov 0   ;;  %v160_v1 = vld [vmem:[#allocation5 + $0x4] ss:$8 sps:$4 sm:$0xff]   ;;  %vm82_vm0 = vcmask 261120   ;;  %v52_v6 = vlaneseq }
  0x27   :  { %118 = vmatprep.mubr.bf16.mxu0 %v244_v0  ;;  %v162_v2 = vld [vmem:[#allocation5] ss:$8 sps:$4 sm:$0xff]   ;;  %86 = vmatprep.subr.bf16.mxu0 %v160_v1  ;;  %v163_v3 = vld [vmem:[#allocation5 + $0x14] ss:$8 sps:$4 sm:$0xff]   ;;  %v165_v4 = vld [vmem:[#allocation5 + $0x10] ss:$8 sps:$4 sm:$0xff]  }
  0x28   :  { %87 = vmatpush1.bf16.msra.mxu0 %v162_v2  ;;  %v45_v5 = vld [vmem:[#allocation2] sm:$0xf]  ;;  %v53_v7 = vshrl.u32 %v52_v6, 7  ;;  %v50_v9 = vld [vmem:[%s322_s2] sm:$0x3]  ;;  %s245_s17 = smov [#allocation7]  }
  0x29   :  { %88 = vmatprep.subr.bf16.mxu0 %v163_v3  ;;  %v129_v19 = vld [vmem:[%s323_s3] sm:$0xff]  ;;  %s139_s18 = sshll.u32 %s245_s17, 4  ;;  %s140_s18 = int_to_ptr.vmem [resolvable:$true] %s139_s18 }
  0x2a   :  { %v58_v8 = vsub.s32 1, %v53_v7  ;;  %v54_v17 = vsub.s32 0, %v53_v7  ;;  %s212_s2 = scalar_lea.vmem %s140_s18, 128  ;;  %p217_p3 = scmp.lt.s32.totalorder %s140_s18, %s140_s18 }
  0x2b   :  { %p213_p2 = scmp.ne.s32.totalorder %s140_s18, %s212_s2  ;;  %p218_p4 = scmp.lt.s32.totalorder %s212_s2, %s212_s2 }
  0x2c   :  { %89 = vmatpush1.bf16.msra.mxu0 %v165_v4  ;;  %v59_v10 = vrot.slane %v50_v9, %v58_v8  ;;  %v55_v18 = vrot.slane %v50_v9, %v54_v17 }
  0x2d   :  { %p219_p5 = por %p218_p4, %p217_p3 }
  0x2f   :  { %153 = vmatmul.mubr.msk.bf16.vlgmr.msra.gmra.mrb[0].mxu0 %vm82_vm0, %v45_v5  ;;  %p220_p6 = pnand %p219_p5, %p213_p2 }
 0x102   :  { %v120_v11 = vpop.f32.mrb[0].mxu0 }
 0x103   :  { %v122_v12 = vpop.f32.mrb[1].mxu0  ;;  %v121_v21 = vadd.f32 %v120_v11, %v55_v18 }
 0x104   :  { %v123_v13 = vadd.f32 %v122_v12, %v59_v10  ;;  %v124_v14 = vpop.f32.mrb[2].mxu0 }
 0x105   :  { %v125_v15 = vpop.f32.mrb[3].mxu0 }
 0x106   :  { %v127_v16 = vmul.f32 1.442695, %v123_v13 }
 0x108   :  { %166 = vpow2.f32 %v127_v16 }
 0x112   :  { %v167_v20 = vpop.eup %166 }
 0x113   :  { %v130_v22 = vmul.f32 %v167_v20, %v129_v19 }
 0x115   :  { %v131_v23 = vadd.f32 %v130_v22, %v121_v21 }
 0x117   :  { %132 = vst [vmem:[#allocation7] sm:$0xff] %v131_v23 }
 0x118   :  { %223 = shalt.err (!%p220_p6)
}
 0x119   :  { %s224_s21 = scalar_lea.hbm %s324_s4, 128 }
 0x11a   :  { %p225_p7 = scmp.ne.s32.totalorder %s324_s4, %s224_s21  ;;  %p228_p8 = scmp.lt.u32.totalorder %s224_s21, %s324_s4 }
 0x11c   :  { %p230_p9 = pnand %p228_p8, %p225_p7 }
 0x11e   :  { %233 = shalt.err (!%p230_p9)
}
 0x11f   :  { %142 = dma.vmem_to_hbm [thread:$0]  %s140_s18, 128, %s324_s4, [#allocation4]  }
 0x120   :  { %238 = dma.done.wait [#allocation4], 128  }
 0x121   :  { %239 = vsyncadd [#allocation4], 4294967168 }
 0x122   :  { %146 = vsyncpa [#allocation3], 1 }
 0x123   :  { %147 = vsyncpa [#allocation6], 1 }
 0x124   :  { %148 = vsyncpa [#allocation4], 1 }

</bundles_post_ra>
